<compile_context>
chip_gen: v7x
topology: tpu7x:2x2x1
jax: 0.10.0
libtpu: 0.0.40
codegen_flags: <defaults>
</compile_context>

<pallas_src>
import functools

import jax
import jax.numpy as jnp
from jax import lax
from jax.experimental import pallas as pl
from jax.experimental.pallas import tpu as pltpu

LN_EPS = 1e-5  # nn.LayerNorm default


def _round_up(x, m):
    return (x + m - 1) // m * m


def _vmem_budget_bytes():
    """Per-generation tile budget (leaves headroom below physical VMEM)."""
    try:
        cap = getattr(pltpu.get_tpu_info(), "vmem_capacity_bytes", None)
    except Exception:
        cap = None
    if cap is None:
        cap = 64 * 2**20                       # conservative: assume v7x
    if cap >= 128 * 2**20:                     # v5e / v6e: 128 MiB physical
        return 96 * 2**20
    return 40 * 2**20                          # v7x: 64 MiB physical


def prepare_prenorm_linear_params(gamma, beta, w, b, *, mxu_dtype=None, tn=None):
    """One-time weight transform -- hoist out of the hot path for static weights.

    Folds the LayerNorm affine into the Linear:
        W' = diag(gamma) @ W        b' = beta @ W + b
    then zero-pads to lane-dense (multiple-of-128) tiles and casts W' to the
    MXU dtype.  NOTE: mxu_dtype defaults to w.dtype; f32 weights take the slow
    multi-pass f32 MXU path (worst on v5e) -- pass mxu_dtype=jnp.bfloat16 for
    the fast path when the accuracy budget allows.
    """
    D = int(w.shape[0])
    mxu_dtype = jnp.dtype(mxu_dtype) if mxu_dtype is not None else jnp.dtype(w.dtype)
    Dp = _round_up(D, 128)

    budget = _vmem_budget_bytes()
    w_isz = mxu_dtype.itemsize
    if tn is None:
        # Resident-W path: the (double-buffered) full padded weight must fit in
        # half the budget; the other half is for x / y-scratch / out tiles.
        if 2 * Dp * Dp * w_isz <= budget // 2:
            tn = Dp
        else:
            tn = min(512, Dp)
    tn = _round_up(min(int(tn), Dp), 128)
    # Safety for very large D: a single W column tile must not eat > half budget.
    while tn > 128 and 2 * Dp * tn * w_isz > budget // 2:
        tn = _round_up(tn // 2, 128)
    Np = _round_up(D, tn)

    gamma32 = gamma.astype(jnp.float32).reshape(D)
    beta32 = beta.astype(jnp.float32).reshape(D)
    w32 = w.astype(jnp.float32)
    b32 = b.astype(jnp.float32).reshape(D)

    w_fold = gamma32[:, None] * w32                   # diag(gamma) @ W
    b_fold = beta32 @ w32 + b32                       # beta @ W + b   (kept f32)

    w2 = jnp.pad(w_fold.astype(mxu_dtype), ((0, Dp - D), (0, Np - D)))
    b2 = jnp.pad(b_fold.reshape(1, D), ((0, 0), (0, Np - D)))

    return dict(w=w2, b=b2, D=D, Dp=Dp, tn=tn, Np=Np, mxu_dtype=mxu_dtype)


def _prenorm_kernel(x_ref, w_ref, b_ref, o_ref, y_ref, *, d_true):
    """Output tile (i, j):  LayerNorm(x row-tile) @ W'[:, j-tile] + b'[j-tile].

    LayerNorm (f32 stats over the true dim) is computed once per row tile at
    j == 0 and cached in the y_ref VMEM scratch; j > 0 reuses it, so the inner
    column loop is pure MXU work + W DMA.
    """
    j = pl.program_id(1)

    @pl.when(j == 0)
    def _():
        x32 = x_ref[...].astype(jnp.float32)                      # (tm, Dp)
        d_pad = x_ref.shape[-1]
        inv_d = 1.0 / d_true
        # Padding lanes of x are zero, so the plain sum gives the true mean.
        mean = jnp.sum(x32, axis=-1, keepdims=True) * inv_d
        centered = x32 - mean
        if d_true != d_pad:
            lane = lax.broadcasted_iota(jnp.int32, x32.shape, 1)
            centered = jnp.where(lane < d_true, centered, 0.0)     # mask pad lanes
        var = jnp.sum(centered * centered, axis=-1, keepdims=True) * inv_d
        xn = centered * lax.rsqrt(var + LN_EPS)
        y_ref[...] = xn.astype(y_ref.dtype)                        # one cast per row tile

    acc = jnp.dot(y_ref[...], w_ref[...], preferred_element_type=jnp.float32)
    o_ref[...] = (acc + b_ref[...]).astype(o_ref.dtype)


def prenorm_linear_apply(x, params, *, tm=None):
    """x: (B, S, D) -> (B, S, D) using prepared (folded / padded) Linear params."""
    B, S, D = x.shape
    assert D == params["D"], "prepared params were built for a different dim"
    Dp, tn, Np = params["Dp"], params["tn"], params["Np"]
    mxu_dtype = params["mxu_dtype"]
    rows = B * S

    budget = _vmem_budget_bytes()
    x_isz = jnp.dtype(x.dtype).itemsize
    w_isz = mxu_dtype.itemsize
    bf16 = jnp.dtype(jnp.bfloat16)
    row_align = 16 if (jnp.dtype(x.dtype) == bf16 or mxu_dtype == bf16) else 8

    # --- row tile size ----------------------------------------------------
    if tm is None:
        tm = 1024 if mxu_dtype == bf16 else 512
    tm = max(row_align, _round_up(min(int(tm), _round_up(rows, row_align)), row_align))
    # >= 2 row tiles whenever rows allow, so the "parallel" row axis can be
    # split across both TensorCores on v7x (and across megacore on v5e/v6e).
    if tm >= rows and rows >= 2 * row_align:
        tm = _round_up((rows + 1) // 2, row_align)

    def _footprint(tm_):
        return (2 * tm_ * Dp * x_isz           # x row tile (double-buffered)
                + 2 * Dp * tn * w_isz          # W column tile
                + 2 * tm_ * tn * x_isz         # output tile
                + tm_ * Dp * w_isz             # cached-LN scratch (single buffer)
                + 2 * 8 * tn * 4)              # bias tile (sublane-padded)

    budget_tiles = (budget * 9) // 10          # leave headroom for compiler scratch
    while tm > row_align and _footprint(tm) > budget_tiles:
        tm = max(row_align, _round_up(tm // 2, row_align))

    Rp = _round_up(rows, tm)
    n_row_tiles = Rp // tm
    n_col_tiles = Np // tn

    # --- pad x (zeros are neutral for the LN sums; sliced off below) -------
    x2 = x.reshape(rows, D)
    if Rp != rows or Dp != D:
        x2 = jnp.pad(x2, ((0, Rp - rows), (0, Dp - D)))

    # W is re-read once per row tile only when it is column-tiled; when
    # tn == Np its block index is grid-invariant and Pallas fetches it once.
    w_reads = 1 if n_col_tiles == 1 else n_row_tiles
    cost = pl.CostEstimate(
        flops=2 * Rp * Dp * Np,
        transcendentals=Rp,                                   # one rsqrt per row
        bytes_accessed=int(Rp * Dp * x_isz                    # x in
                           + w_reads * Dp * Np * w_isz        # W (re-)reads
                           + Np * 4                           # folded bias
                           + Rp * Np * x_isz))                # out

    # TODO(synk): pipeline_mode=pl.Buffered(1) on the grid-invariant W / bias
    # specs would halve their VMEM footprint (most useful on v7x's 64 MiB).
    out = pl.pallas_call(
        functools.partial(_prenorm_kernel, d_true=D),
        out_shape=jax.ShapeDtypeStruct((Rp, Np), x.dtype),
        grid_spec=pltpu.PrefetchScalarGridSpec(
            num_scalar_prefetch=0,
            grid=(n_row_tiles, n_col_tiles),
            in_specs=[
                pl.BlockSpec((tm, Dp), lambda i, j: (i, 0)),   # x row tile (full dim for LN)
                pl.BlockSpec((Dp, tn), lambda i, j: (0, j)),   # folded W column tile
                pl.BlockSpec((1, tn), lambda i, j: (0, j)),    # folded bias (f32)
            ],
            out_specs=pl.BlockSpec((tm, tn), lambda i, j: (i, j)),
            scratch_shapes=[pltpu.VMEM((tm, Dp), mxu_dtype)],  # cached LayerNorm(x) tile
        ),
        compiler_params=pltpu.CompilerParams(
            dimension_semantics=("parallel", "arbitrary"),
            vmem_limit_bytes=int(budget),
        ),
        cost_estimate=cost,
    )(x2, params["w"], params["b"])

    if Rp == rows and Np == D:
        return out.reshape(B, S, D)            # no extra slice pass when aligned
    return out[:rows, :D].reshape(B, S, D)


def prenorm_linear(x, gamma, beta, w, b, *, tm=None, tn=None, mxu_dtype=None):
    """Convenience wrapper: prep (fold + pad + cast) then apply.

    For static weights, call prepare_prenorm_linear_params once and reuse it
    with prenorm_linear_apply so the D^2 pad/cast never hits the hot path.
    """
    params = prepare_prenorm_linear_params(gamma, beta, w, b,
                                           mxu_dtype=mxu_dtype, tn=tn)
    return prenorm_linear_apply(x, params, tm=tm)


def prenorm_linear_ref(x, gamma, beta, w, b):
    """Pure-JAX reference for correctness check."""
    xf = x.astype(jnp.float32)
    mean = jnp.mean(xf, axis=-1, keepdims=True)
    var = jnp.mean((xf - mean) ** 2, axis=-1, keepdims=True)
    xn = (xf - mean) / jnp.sqrt(var + LN_EPS)
    y = xn * gamma.astype(jnp.float32) + beta.astype(jnp.float32)
    return (y @ w.astype(jnp.float32) + b.astype(jnp.float32)).astype(x.dtype)


if __name__ == "__main__":
    # --- Test 1: f32, small dim (lane padding 32 -> 128, masked LN stats,
    #     resident-W 1-D grid, two row tiles for the parallel axis) ---------
    B, S, D = 2, 8, 32
    kx, kg, kb, kw, kbi = jax.random.split(jax.random.PRNGKey(0), 5)
    x = jax.random.normal(kx, (B, S, D), dtype=jnp.float32)
    gamma = jnp.ones((D,), jnp.float32) + 0.01 * jax.random.normal(kg, (D,))
    beta = 0.01 * jax.random.normal(kb, (D,), dtype=jnp.float32)
    w = jax.random.normal(kw, (D, D), dtype=jnp.float32) / jnp.sqrt(D)
    b = 0.01 * jax.random.normal(kbi, (D,), dtype=jnp.float32)

    out = prenorm_linear(x, gamma, beta, w, b)
    jax.block_until_ready(out)
    ref = prenorm_linear_ref(x, gamma, beta, w, b)
    assert out.shape == (B, S, D)
    assert jnp.allclose(out, ref, atol=1e-4, rtol=1e-4), "f32 mismatch vs reference"

    # --- Test 2: bf16 MXU fast path with prep hoisted once; tn=128 < Dp=256
    #     forces the 2-D grid so the cached-LayerNorm scratch is reused across
    #     column tiles (and the aligned no-slice output path is taken) -------
    B2, S2, D2 = 2, 16, 256
    k2x, k2g, k2b, k2w, k2bi = jax.random.split(jax.random.PRNGKey(1), 5)
    xb = jax.random.normal(k2x, (B2, S2, D2), dtype=jnp.float32).astype(jnp.bfloat16)
    gb = (jnp.ones((D2,)) + 0.01 * jax.random.normal(k2g, (D2,))).astype(jnp.bfloat16)
    bb = (0.01 * jax.random.normal(k2b, (D2,))).astype(jnp.bfloat16)
    wb = (jax.random.normal(k2w, (D2, D2)) / jnp.sqrt(D2)).astype(jnp.bfloat16)
    bib = (0.01 * jax.random.normal(k2bi, (D2,))).astype(jnp.bfloat16)

    params2 = prepare_prenorm_linear_params(gb, bb, wb, bib,
                                            mxu_dtype=jnp.bfloat16, tn=128)
    out2 = prenorm_linear_apply(xb, params2)
    jax.block_until_ready(out2)
    ref2 = prenorm_linear_ref(xb, gb, bb, wb, bib)
    assert out2.shape == (B2, S2, D2)
    assert jnp.allclose(out2.astype(jnp.float32), ref2.astype(jnp.float32),
                        atol=1e-1, rtol=1e-1), "bf16 mismatch vs reference"

    print("KERNEL_OK")
</pallas_src>

<mosaic_0001>
module attributes {stable_mosaic.version = 11 : i64} {
  func.func @_prenorm_kernel(%arg0: i32, %arg1: i32, %arg2: memref<8x128xf32, #tpu.memory_space<vmem>>, %arg3: memref<128x128xf32, #tpu.memory_space<vmem>>, %arg4: memref<1x128xf32, #tpu.memory_space<vmem>>, %arg5: memref<8x128xf32, #tpu.memory_space<vmem>>, %arg6: memref<8x128xf32, #tpu.memory_space<vmem>>) attributes {dimension_semantics = [#tpu.dimension_semantics<parallel>, #tpu.dimension_semantics<arbitrary>], iteration_bounds = array<i64: 2, 1>, scalar_prefetch = 0 : i64, scratch_operands = 1 : i64, tpu.core_type = #tpu.core_type<tc>, window_params = [{transform_indices = @transform_0, window_bounds = array<i64: 8, 128>}, {transform_indices = @transform_1, window_bounds = array<i64: 128, 128>}, {transform_indices = @transform_2, window_bounds = array<i64: 1, 128>}, {transform_indices = @transform_3, window_bounds = array<i64: 8, 128>}]} {
    %c0_i32 = arith.constant 0 : i32
    %0 = arith.cmpi eq, %arg1, %c0_i32 : i32
    %1 = arith.extui %0 : i1 to i32
    %c0_i32_0 = arith.constant 0 : i32
    %2 = arith.cmpi ne, %1, %c0_i32_0 : i32
    scf.if %2 {
      %c0_8 = arith.constant 0 : index
      %c0_9 = arith.constant 0 : index
      %10 = vector.load %arg2[%c0_8, %c0_9] : memref<8x128xf32, #tpu.memory_space<vmem>>, vector<8x128xf32>
      %cst_10 = arith.constant dense<0.000000e+00> : vector<8xf32>
      %11 = vector.multi_reduction <add>, %10, %cst_10 [1] : vector<8x128xf32> to vector<8xf32>
      %12 = vector.shape_cast %11 : vector<8xf32> to vector<8x1xf32>
      %cst_11 = arith.constant 3.125000e-02 : f32
      %13 = vector.broadcast %cst_11 : f32 to vector<8x1xf32>
      %14 = arith.mulf %12, %13 : vector<8x1xf32>
      %15 = vector.broadcast %14 : vector<8x1xf32> to vector<8x128xf32>
      %16 = arith.subf %10, %15 : vector<8x128xf32>
      %17 = tpu.iota {dimensions = array<i32: 1>} : vector<8x128xi32>
      %c32_i32 = arith.constant 32 : i32
      %18 = vector.broadcast %c32_i32 : i32 to vector<8x128xi32>
      %19 = arith.cmpi slt, %17, %18 : vector<8x128xi32>
      %cst_12 = arith.constant 0.000000e+00 : f32
      %20 = vector.broadcast %cst_12 : f32 to vector<8x128xf32>
      %21 = arith.select %19, %16, %20 : vector<8x128xi1>, vector<8x128xf32>
      %22 = arith.mulf %21, %21 : vector<8x128xf32>
      %cst_13 = arith.constant dense<0.000000e+00> : vector<8xf32>
      %23 = vector.multi_reduction <add>, %22, %cst_13 [1] : vector<8x128xf32> to vector<8xf32>
      %24 = vector.shape_cast %23 : vector<8xf32> to vector<8x1xf32>
      %cst_14 = arith.constant 3.125000e-02 : f32
      %25 = vector.broadcast %cst_14 : f32 to vector<8x1xf32>
      %26 = arith.mulf %24, %25 : vector<8x1xf32>
      %cst_15 = arith.constant 9.99999974E-6 : f32
      %27 = vector.broadcast %cst_15 : f32 to vector<8x1xf32>
      %28 = arith.addf %26, %27 : vector<8x1xf32>
      %29 = math.rsqrt %28 : vector<8x1xf32>
      %30 = vector.broadcast %29 : vector<8x1xf32> to vector<8x128xf32>
      %31 = arith.mulf %21, %30 : vector<8x128xf32>
      %c0_16 = arith.constant 0 : index
      %c0_17 = arith.constant 0 : index
      %32 = vector.load %arg6[%c0_16, %c0_17] : memref<8x128xf32, #tpu.memory_space<vmem>>, vector<8x128xf32>
      tpu.vector_store %arg6[%c0_16, %c0_17], %31 {strides = array<i32>} : memref<8x128xf32, #tpu.memory_space<vmem>>, vector<8x128xf32>,
    } else {
    }
    %c0 = arith.constant 0 : index
    %c0_1 = arith.constant 0 : index
    %3 = vector.load %arg6[%c0, %c0_1] : memref<8x128xf32, #tpu.memory_space<vmem>>, vector<8x128xf32>
    %c0_2 = arith.constant 0 : index
    %c0_3 = arith.constant 0 : index
    %4 = vector.load %arg3[%c0_2, %c0_3] : memref<128x128xf32, #tpu.memory_space<vmem>>, vector<128x128xf32>
    %cst = arith.constant dense<0.000000e+00> : vector<8x128xf32>
    %5 = tpu.matmul %3, %4, %cst {dimension_numbers = #tpu.dot_dimension_numbers<[1], [0], [0], [1], [0, 0, 1, 1], [], []>} : vector<8x128xf32>, vector<128x128xf32>, vector<8x128xf32> -> vector<8x128xf32>
    %c0_4 = arith.constant 0 : index
    %c0_5 = arith.constant 0 : index
    %6 = vector.load %arg4[%c0_4, %c0_5] : memref<1x128xf32, #tpu.memory_space<vmem>>, vector<1x128xf32>
    %7 = vector.broadcast %6 : vector<1x128xf32> to vector<8x128xf32>
    %8 = arith.addf %5, %7 : vector<8x128xf32>
    %c0_6 = arith.constant 0 : index
    %c0_7 = arith.constant 0 : index
    %9 = vector.load %arg5[%c0_6, %c0_7] : memref<8x128xf32, #tpu.memory_space<vmem>>, vector<8x128xf32>
    tpu.vector_store %arg5[%c0_6, %c0_7], %8 {strides = array<i32>} : memref<8x128xf32, #tpu.memory_space<vmem>>, vector<8x128xf32>,
    return
  }
  func.func @transform_0(%arg0: i32, %arg1: i32) -> (i32, i32) {
    %c0_i32 = arith.constant 0 : i32
    %c0_i32_0 = arith.constant 0 : i32
    return %arg0, %c0_i32 : i32, i32
  }
  func.func @transform_1(%arg0: i32, %arg1: i32) -> (i32, i32) {
    %c0_i32 = arith.constant 0 : i32
    %c0_i32_0 = arith.constant 0 : i32
    return %c0_i32, %arg1 : i32, i32
  }
  func.func @transform_2(%arg0: i32, %arg1: i32) -> (i32, i32) {
    %c0_i32 = arith.constant 0 : i32
    %c0_i32_0 = arith.constant 0 : i32
    return %c0_i32, %arg1 : i32, i32
  }
  func.func @transform_3(%arg0: i32, %arg1: i32) -> (i32, i32) {
    %c0_i32 = arith.constant 0 : i32
    return %arg0, %arg1 : i32, i32
  }
}

</mosaic_0001>

<bundles_post_ra>
// kernel: tpu_custom_call.1
= control target key start
LH: loop header
LB: loop body
LE: loop exit
PB: predicated region body
PF: predicated region fallthrough
CT: control target
= control target key end

     0   :  { %8 = vsyncpa [#allocation4], 0  ;;  %s1038_s0 = inlined_call_operand.hbm [shape: f32[16,128], index: 0, kind: input, shape index: {}]   ;;  %s1039_s1 = inlined_call_operand.hbm [shape: f32[128,128], index: 1, kind: input, shape index: {}]   ;;  %s1040_s2 = inlined_call_operand.vmem [shape: f32[1,128], index: 2, kind: input, shape index: {}]   ;;  %s1041_s3 = inlined_call_operand.hbm [shape: f32[16,128], index: 3, kind: output, shape index: {}]  }
   0x1   :  { %10 = vsyncpa [#allocation4 + $0x1], 0 }
   0x2   :  { %11 = vsyncpa [#allocation7], 0 }
   0x3   :  { %12 = vsyncpa [#allocation5], 0 }
   0x4   :  { %14 = vsyncpa [#allocation5 + $0x1], 0  ;;  %s817_s12 = smov 0   ;;  %s819_s13 = smov 0  }
   0x5   :  { %s821_s14 = smov 0   ;;  %s823_s15 = smov 0  }
   0x6   :  { %s825_s16 = smov 0   ;;  %s827_s17 = smov 0  }
   0x7 LB: > { %s470_s18 = sadd.s32 4294967295, %s787_s17   ;;  %s471_s19 = sadd.s32 4294967294, %s787_s17   ;;  %s787_s17 = sphi %s827_s17, %s20_s17   ;;  %s783_s16 = sphi %s825_s16, %s1065_s16   ;;  %s779_s15 = sphi %s823_s15, %s1064_s15   ;;  %s775_s14 = sphi %s821_s14, %s1063_s14   ;;  %s771_s13 = sphi %s819_s13, %s1062_s13   ;;  %s767_s12 = sphi %s817_s12, %s1061_s12  }
   0x8   : > { %p52_p0 = scmp.ne.s32.totalorder %s771_s13, %s767_s12  ;;  %p851_p1 = scmp.eq.s32.totalorder %s470_s18, 0 }
   0x9   : > { %p855_p2 = scmp.eq.s32.totalorder %s470_s18, 1  ;;  %p136_p3 = scmp.eq.s32.totalorder %s471_s19, 1 }
   0xa   : > { %s1046_s20 = scalar_select %p851_p1, 1, 0 }
   0xb   : > { %s1047_s21 = scalar_select %p855_p2, 1, 0 }
   0xc   : > { %p861_p4 = por %p851_p1, %p52_p0  ;;  %p472_p5 = scmp.ge.s32.totalorder %s787_s17, 1 }
   0xd   : > { %p866_p6 = por %p136_p3, %p52_p0  ;;  %p143_p7 = scmp.lt.s32.totalorder %s787_s17, 3 }
   0xe   : > { %s1048_s22 = scalar_select %p861_p4, 1, 0 }
   0xf   : > { %s1049_s23 = scalar_select %p866_p6, 1, 0 }
  0x10   : > { %p871_p8 = pnand %p472_p5, %p143_p7  ;;  %s789_s25 = smov [#allocation6]  }
  0x11   : > { %s157_s26 = sshll.u32 %s789_s25, 4  ;;  %s32_s28 = sadd.s32 1, %s783_s16  ;;  %s158_s26 = int_to_ptr.vmem [resolvable:$true] %s157_s26 }
  0x12   : > { %s1050_s24 = scalar_select %p871_p8, 1, 0 }
  0x13   : > { %p571_p9 = pneg %p871_p8  ;;  %s643_s4 = scalar_lea.hbm %s1039_s1, 2048 }
  0x14   : > { %p644_p12 = scmp.ne.s32.totalorder %s1039_s1, %s643_s4  ;;  %p650_p5 = scmp.lt.u32.totalorder %s643_s4, %s1039_s1 }
  0x15   : > { %p880_p11 = pnand %p571_p9, %p851_p1 }
  0x17   : > { %p645_p13 = pneg %p880_p11 }
  0x19   : > { %p646_p0 = pnand %p645_p13, %p644_p12 }
  0x1b   : > { %p647_p3 = pneg %p646_p0 }
  0x1d   : > { %p652_p7 = pnand %p650_p5, %p647_p3 }
  0x1f   : > { %655 = shalt.err (!%p652_p7)
}
  0x20   : > { %s656_s9 = scalar_lea.vmem %s158_s26, 2048  ;;  %p664_p1 = scmp.lt.s32.totalorder %s158_s26, %s158_s26 }
  0x21   : > { %p657_p9 = scmp.ne.s32.totalorder %s158_s26, %s656_s9  ;;  %p665_p4 = scmp.lt.s32.totalorder %s656_s9, %s656_s9 }
  0x23   : > { %p659_p10 = pnand %p657_p9, %p645_p13  ;;  %p666_p8 = por %p665_p4, %p664_p1 }
  0x25   : > { %p660_p6 = pneg %p659_p10 }
  0x27   : > { %p667_p2 = pnand %p666_p8, %p660_p6 }
  0x29   : > { %670 = shalt.err (!%p667_p2)
}
  0x2a   : > { %s790_s10 = smov 128   ;;  %s791_s11 = smov 8  }
  0x2b   : > { %574 = dma.hbm_to_vmem [thread:$0]  (!%p880_p11), %s1039_s1, 2048, %s158_s26, [#allocation7], %s790_s10, %s790_s10, %s791_s11  }
  0x2c   : > { %p34_p1 = scmp.ge.s32.totalorder %s32_s28, 2  ;;  %s39_s25 = sadd.s32 1, %s775_s14 }
  0x2d   : > { %p46_p2 = scmp.ne.s32.totalorder %s775_s14, %s771_s13  ;;  %p47_p4 = scmp.eq.s32.totalorder %s787_s17, 0 }
  0x2e   : > { %s1067_s28 = smov (%p34_p1, %s32_s28), 0  ;;  %p1053_p8 = scmp.ne.s32.totalorder %s1047_s21, 0 }
  0x2f   : > { %p907_p6 = por %p47_p4, %p46_p2  ;;  %s36_s27 = ssub.s32 %s783_s16, %s1067_s28 }
  0x30   : > { %p913_p10 = por %p1053_p8, %p46_p2  ;;  %p584_p12 = scmp.lt.s32.totalorder %s787_s17, 2 }
  0x31   : > { %p37_p11 = scmp.eq.s32.totalorder %s36_s27, 0  ;;  %s177_s26 = sand.u32 1, %s775_s14  }
  0x32   : > { %s476_s4 = sshll.u32 %s177_s26, 3  ;;  %s477_s6 = sshll.u32 %s783_s16, 7 }
  0x33   : > { %s922_s5 = scalar_select %p37_p11, %s775_s14, %s39_s25  }
  0x34   : > { %s928_s9 = scalar_lea.hbm %s1038_s0, %s477_s6  ;;  %s181_s21 = scalar_lea.vmem [#allocation3], %s476_s4 }
  0x35   : > { %s188_s10 = sshll.u32 %s181_s21, 4  ;;  %p934_p13 = pnand %p584_p12, %p907_p6  ;;  %s930_s10 = int_to_ptr.vmem [resolvable:$true] %s188_s10 }
  0x36   : > { %s178_s18 = scalar_lea.sflag [#allocation4], %s177_s26  ;;  %s671_s19 = scalar_lea.hbm %s928_s9, 128 }
  0x37   : > { %p672_p0 = scmp.ne.s32.totalorder %s928_s9, %s671_s19  ;;  %p673_p3 = pneg %p934_p13 }
  0x38   : > { %s676_s4 = scalar_lea.hbm %s1038_s0, 256  ;;  %p677_p9 = scmp.lt.u32.totalorder %s928_s9, %s1038_s0 }
  0x39   : > { %p674_p5 = pnand %p673_p3, %p672_p0  ;;  %p678_p1 = scmp.lt.u32.totalorder %s676_s4, %s671_s19 }
  0x3a   : > { %p680_p4 = scmp.lt.u32.totalorder %s671_s19, %s928_s9 }
  0x3b   : > { %p675_p7 = pneg %p674_p5  ;;  %p679_p2 = por %p678_p1, %p677_p9 }
  0x3d   : > { %p681_p6 = por %p680_p4, %p679_p2 }
  0x3f   : > { %p682_p8 = pnand %p681_p6, %p675_p7 }
  0x41   : > { %685 = shalt.err (!%p682_p8)
}
  0x42   : > { %s686_s26 = scalar_lea.vmem %s930_s10, 128  ;;  %s792_s7 = smov [#allocation3]  }
  0x43   : > { %p687_p12 = scmp.ne.s32.totalorder %s930_s10, %s686_s26  ;;  %s691_s8 = sshll.u32 %s792_s7, 4  ;;  %s692_s8 = int_to_ptr.vmem [resolvable:$false] %s691_s8 }
  0x44   : > { %s693_s21 = scalar_lea.vmem %s692_s8, 256  ;;  %p694_p5 = scmp.lt.s32.totalorder %s930_s10, %s692_s8 }
  0x45   : > { %p689_p11 = pnand %p687_p12, %p673_p3  ;;  %p695_p9 = scmp.lt.s32.totalorder %s693_s21, %s686_s26 }
  0x47   : > { %p690_p0 = pneg %p689_p11  ;;  %p696_p1 = por %p695_p9, %p694_p5 }
  0x49   : > { %p697_p2 = pnand %p696_p1, %p690_p0 }
  0x4b   : > { %700 = shalt.err (!%p697_p2)
}
  0x4c   : > { %578 = dma.hbm_to_vmem [thread:$0]  (!%p934_p13), %s928_s9, 128, %s930_s10, %s178_s18  }
  0x4d   : > { %p1056_p7 = scmp.ne.s32.totalorder %s1050_s24, 0 }
  0x4e   : > { %s966_s19 = sand.u32 (!%p1056_p7), 1, %s771_s13   ;;  %p1057_p3 = scmp.ne.s32.totalorder (!%p1056_p7), %s1048_s22, 0 }
  0x4f   : > { %197 = sbr.rel (%p1056_p7) target bundleno = 627 (0x273), region = 32  ;;  %s479_s25 = sshll.u32 (!%p1056_p7), %s966_s19, 3 }
  0x50   : > { %s200_s27 = scalar_lea.sflag (!%p1056_p7), [#allocation4], %s966_s19  ;;  %s203_s4 = scalar_lea.vmem (!%p1056_p7), [#allocation3], %s479_s25 }
  0x56   : > { %754 = dma.done.wait (%p1057_p3), %s200_s27, 128  }
  0x57   : > { %756 = vsyncadd (%p1057_p3), %s200_s27, 4294967168  ;;  %p1058_p13 = scmp.ne.s32.totalorder %s1046_s20, 0 }
  0x59   : > { %758 = dma.done.wait (%p1058_p13), [#allocation7], 2048  }
  0x5a   : > { %760 = vsyncadd (%p1058_p13), [#allocation7], 4294965248  ;;  %v240_v0 = vld [vmem:[%s203_s4] sm:$0xff]  ;;  %v258_v1 = vld [vmem:[#allocation6] sm:$0xff]  ;;  %v793_v4 = vmov 0.0|0.0   ;;  %v245_v14 = vlaneseq  ;;  %vm794_vm1 = vmmov 0  }
  0x5b   : > { %241 = vadd.xlane.f32.xlu0 %v240_v0  ;;  %v259_v2 = vld [vmem:[#allocation6 + $0x8] sm:$0xff]  ;;  %v260_v3 = vld [vmem:[#allocation6 + $0x10] sm:$0xff]  ;;  %539 = vmatprep.subr.bf16.mxu0 %v793_v4  ;;  %v261_v6 = vld [vmem:[#allocation6 + $0x18] sm:$0xff]  ;;  %v795_v29 = vmov 0.0   ;;  %s484_s24 = sshll.u32 %s779_s15, 7  ;;  %s232_s9 = scalar_lea.vmem [#allocation8], %s479_s25 }
  0x5c   : > { %v540_v5 = vpack.c.bf16 %v259_v2, %v258_v1  ;;  %v543_v7 = vpack.c.bf16 %v261_v6, %v260_v3  ;;  %v262_v8 = vld [vmem:[#allocation6 + $0x20] sm:$0xff]  ;;  %v263_v9 = vld [vmem:[#allocation6 + $0x28] sm:$0xff]  ;;  %v264_v11 = vld [vmem:[#allocation6 + $0x30] sm:$0xff]  ;;  %v246_v15 = vand.u32 127, %v245_v14  ;;  %536 = vmatprep.mubr.msk.f32.mxu0 %vm794_vm1, %v795_v29  ;;  %s367_s10 = sshll.u32 %s232_s9, 4  ;;  %s989_s29 = scalar_lea.hbm %s1041_s3, %s484_s24  ;;  %s991_s10 = int_to_ptr.vmem [resolvable:$true] %s367_s10 }
  0x5d   : > { %v546_v10 = vpack.c.bf16 %v263_v9, %v262_v8  ;;  %v265_v12 = vld [vmem:[#allocation6 + $0x38] sm:$0xff]  ;;  %v266_v21 = vld [vmem:[#allocation6 + $0x40] sm:$0xff]  ;;  %v267_v22 = vld [vmem:[#allocation6 + $0x48] sm:$0xff]  ;;  %s353_s6 = scalar_lea.sflag [#allocation5], %s966_s19  ;;  %s701_s26 = scalar_lea.vmem %s991_s10, 128 }
  0x5e   : > { %541 = vmatpush3.bf16.msra.mxu0 %v540_v5  ;;  %v549_v13 = vpack.c.bf16 %v265_v12, %v264_v11  ;;  %vm247_vm0 = vcmp.lt.s32.totalorder %v246_v15, 32  ;;  %v552_v23 = vpack.c.bf16 %v267_v22, %v266_v21  ;;  %v268_v24 = vld [vmem:[#allocation6 + $0x50] sm:$0xff]  ;;  %v269_v25 = vld [vmem:[#allocation6 + $0x58] sm:$0xff]  ;;  %v270_v27 = vld [vmem:[#allocation6 + $0x60] sm:$0xff]  ;;  %p702_p4 = scmp.ne.s32.totalorder %s991_s10, %s701_s26  ;;  %s796_s15 = smov [#allocation8]  }
  0x5f   : > { %542 = vmatprep.subr.bf16.mxu0 %v793_v4  ;;  %v555_v26 = vpack.c.bf16 %v269_v25, %v268_v24  ;;  %v271_v28 = vld [vmem:[#allocation6 + $0x68] sm:$0xff]  ;;  %v272_v31 = vld [vmem:[#allocation6 + $0x70] sm:$0xff]  ;;  %v273_v32 = vld [vmem:[#allocation6 + $0x78] sm:$0xff]  ;;  %s705_s7 = sshll.u32 %s796_s15, 4  ;;  %s706_s7 = int_to_ptr.vmem [resolvable:$false] %s705_s7 }
  0x60   : > { %v558_v30 = vpack.c.bf16 %v271_v28, %v270_v27  ;;  %v561_v33 = vpack.c.bf16 %v273_v32, %v272_v31  ;;  %v482_v39 = vld [vmem:[%s1040_s2] ss:$0 sm:$0xff]  ;;  %p703_p6 = pnand %p702_p4, %p913_p10  ;;  %s707_s8 = scalar_lea.vmem %s706_s7, 256 }
  0x61   : > { %p708_p12 = scmp.lt.s32.totalorder %s991_s10, %s706_s7  ;;  %p709_p11 = scmp.lt.s32.totalorder %s707_s8, %s701_s26 }
  0x62   : > { %544 = vmatpush3.bf16.msra.mxu0 %v543_v7  ;;  %p704_p8 = pneg %p703_p6 }
  0x63   : > { %545 = vmatprep.subr.bf16.mxu0 %v793_v4  ;;  %p710_p0 = por %p709_p11, %p708_p12 }
  0x65   : > { %p711_p5 = pnand %p710_p0, %p704_p8 }
  0x66   : > { %547 = vmatpush3.bf16.msra.mxu0 %v546_v10 }
  0x67   : > { %548 = vmatprep.subr.bf16.mxu0 %v793_v4 }
  0x6a   : > { %550 = vmatpush3.bf16.msra.mxu0 %v549_v13 }
  0x6b   : > { %551 = vmatprep.subr.bf16.mxu0 %v793_v4 }
  0x6e   : > { %553 = vmatpush3.bf16.msra.mxu0 %v552_v23 }
  0x6f   : > { %554 = vmatprep.subr.bf16.mxu0 %v793_v4 }
  0x72   : > { %556 = vmatpush3.bf16.msra.mxu0 %v555_v26 }
  0x73   : > { %557 = vmatprep.subr.bf16.mxu0 %v793_v4 }
  0x76   : > { %559 = vmatpush3.bf16.msra.mxu0 %v558_v30 }
  0x77   : > { %560 = vmatprep.subr.bf16.mxu0 %v793_v4 }
  0x7a   : > { %562 = vmatpush3.bf16.msra.mxu0 %v561_v33 }
  0xe8   : > { %v242_v16 = vpop.xlane.xlu0 %241 }
  0xe9   : > { %v243_v17 = vmul.f32 0.03125, %v242_v16 }
  0xeb   : > { %v244_v18 = vsub.f32 %v240_v0, %v243_v17 }
  0xed   : > { %v248_v19 = vsel %vm247_vm0, %v244_v18, 0.0 }
  0xee   : > { %v249_v20 = vmul.f32 %v248_v19, %v248_v19 }
  0xf0   : > { %250 = vadd.xlane.f32.xlu0 %v249_v20 }
 0x17d   : > { %v251_v34 = vpop.xlane.xlu0 %250 }
 0x17e   : > { %v252_v35 = vmul.f32 0.03125, %v251_v34 }
 0x180   : > { %v253_v36 = vadd.f32 1e-05, %v252_v35 }
 0x182   : > { %641 = vrsqrt.f32 %v253_v36 }
 0x18c   : > { %v642_v37 = vpop.eup %641 }
 0x18d   : > { %v255_v38 = vmul.f32 %v642_v37, %v248_v19 }
 0x18f   : > { %537 = vmatmul.mubr.f32.vlgmr.msra.gmra.mrb[0].mxu0 %v255_v38 }
 0x262   : > { %v347_v40 = vpop.f32.mrb[0].mxu0 }
 0x263   : > { %v348_v41 = vadd.f32 %v482_v39, %v347_v40  ;;  %v538_v42 = vpop.f32.mrb[1].mxu0 }
 0x265   : > { %351 = vst [vmem:[%s232_s9] sm:$0xff] %v348_v41 }
 0x266   : > { %714 = shalt.err (!%p711_p5)
}
 0x267   : > { %s715_s21 = scalar_lea.hbm %s989_s29, 128  ;;  %s719_s27 = scalar_lea.hbm %s1041_s3, 256 }
 0x268   : > { %p716_p9 = scmp.ne.s32.totalorder %s989_s29, %s715_s21  ;;  %p720_p7 = scmp.lt.u32.totalorder %s989_s29, %s1041_s3 }
 0x269   : > { %p721_p3 = scmp.lt.u32.totalorder %s719_s27, %s715_s21  ;;  %p723_p4 = scmp.lt.u32.totalorder %s715_s21, %s989_s29 }
 0x26a   : > { %p717_p1 = pnand %p716_p9, %p913_p10 }
 0x26b   : > { %p722_p13 = por %p721_p3, %p720_p7 }
 0x26c   : > { %p718_p2 = pneg %p717_p1 }
 0x26d   : > { %p724_p6 = por %p723_p4, %p722_p13 }
 0x26f   : > { %p725_p8 = pnand %p724_p6, %p718_p2 }
 0x271   : > { %728 = shalt.err (!%p725_p8)
}
 0x272   : > { %569 = dma.vmem_to_hbm [thread:$0]  (%p913_p10), %s991_s10, 128, %s989_s29, %s353_s6  }
 0x273 PF: > { %s379_s22 = sand.u32 1, %s767_s12   ;;  %p1059_p12 = scmp.ne.s32.totalorder %s1049_s23, 0 }
 0x274   : > { %p1060_p11 = scmp.ge.s32.totalorder %s787_s17, 2  ;;  %s380_s24 = scalar_lea.sflag [#allocation5], %s379_s22 }
 0x276   : > { %p580_p0 = pnand %p1060_p11, %p1059_p12 }
 0x278   : > { %762 = dma.done.wait (!%p580_p0), %s380_s24, 128  }
 0x279   : > { %764 = vsyncadd (!%p580_p0), %s380_s24, 4294967168  ;;  %s20_s17 = sadd.s32 1, %s787_s17   ;;  %s1061_s12 = smov %s771_s13 }
 0x27a   : > { %p17_p5 = scmp.ge.s32.totalorder %s20_s17, 4   ;;  %s1062_s13 = smov %s775_s14 }
 0x27b   : > { %s1063_s14 = smov %s922_s5  ;;  %s1064_s15 = smov %s783_s16 }
 0x27c   : > { %s1065_s16 = smov %s1067_s28  ;;  %19 = sbr.rel (!%p17_p5) target bundleno = 7 (0x7), region = 89 }
 0x283   :  { %385 = vsyncpa [#allocation4], 1 }
 0x284   :  { %387 = vsyncpa [#allocation4 + $0x1], 1 }
 0x285   :  { %388 = vsyncpa [#allocation7], 1 }
 0x286   :  { %389 = vsyncpa [#allocation5], 1 }
 0x287   :  { %391 = vsyncpa [#allocation5 + $0x1], 1 }

</bundles_post_ra>
